<compile_context>
chip_gen: v7x
topology: tpu7x:2x2x1
jax: 0.10.0
libtpu: 0.0.40
codegen_flags: <defaults>
</compile_context>

<pallas_src>
import functools

import jax
import jax.numpy as jnp
from jax.experimental import pallas as pl
from jax.experimental.pallas import tpu as pltpu

LANE = 128  # TPU lane width


def _round_up(n, m):
    return (n + m - 1) // m * m


def policy_mlp_kernel(x_ref, w1_ref, b1_ref, w2_ref, b2_ref, w3_ref, b3_ref,
                      o_ref):
    """One batch tile: x [TB, in]; weights [in, out]-layout; biases f32 [1, out]."""
    cdt = w1_ref.dtype  # matmul operand dtype (f32 or bf16)

    # fc1 + tanh (accumulate in f32, elementwise in f32)
    h1 = jnp.tanh(
        jnp.dot(x_ref[...], w1_ref[...], preferred_element_type=jnp.float32)
        + b1_ref[...])
    # fc2 + tanh
    h2 = jnp.tanh(
        jnp.dot(h1.astype(cdt), w2_ref[...], preferred_element_type=jnp.float32)
        + b2_ref[...])
    # fc3 (output lanes padded to 128; padded bias lanes are -inf)
    logits = (jnp.dot(h2.astype(cdt), w3_ref[...],
                      preferred_element_type=jnp.float32) + b3_ref[...])
    # softmax over lanes; padded columns contribute exp(-inf) == 0 exactly.
    m = jnp.max(logits, axis=-1, keepdims=True)
    e = jnp.exp(logits - m)
    denom = jnp.sum(e, axis=-1, keepdims=True)
    o_ref[...] = (e * pl.reciprocal(denom, approx=False)).astype(o_ref.dtype)


def init_params(key, input_dim=4, hidden_dim=128, output_dim=2):
    """Deterministic synthetic init matching nn.Linear shapes ([out, in])."""
    ks = jax.random.split(key, 6)

    def u(k, shape, fan_in):
        bound = 1.0 / jnp.sqrt(fan_in)
        return jax.random.uniform(k, shape, jnp.float32, -bound, bound)

    w1 = u(ks[0], (hidden_dim, input_dim), input_dim)
    b1 = u(ks[1], (hidden_dim,), input_dim)
    w2 = u(ks[2], (hidden_dim, hidden_dim), hidden_dim)
    b2 = u(ks[3], (hidden_dim,), hidden_dim)
    w3 = u(ks[4], (output_dim, hidden_dim), hidden_dim)
    b3 = u(ks[5], (output_dim,), hidden_dim)
    return (w1, b1, w2, b2, w3, b3)


def prepare_params(torch_params, compute_dtype=jnp.float32):
    """One-time conversion PyTorch [out, in] -> kernel layout.

    Weights become [in, out] in `compute_dtype`; fc3 is padded to 128 output
    lanes (zeros in W, -inf in bias) for lane-dense stores. Biases stay f32.
    Returns (kernel_params, output_dim).
    """
    w1, b1, w2, b2, w3, b3 = torch_params
    output_dim, hidden_dim = w3.shape
    out_pad = _round_up(max(output_dim, LANE), LANE)

    w1k = jnp.asarray(w1.T, compute_dtype)                      # [in, hidden]
    w2k = jnp.asarray(w2.T, compute_dtype)                      # [hidden, hidden]
    w3k = jnp.zeros((hidden_dim, out_pad), compute_dtype)
    w3k = w3k.at[:, :output_dim].set(jnp.asarray(w3.T, compute_dtype))

    b1k = jnp.asarray(b1, jnp.float32)[None, :]                 # [1, hidden]
    b2k = jnp.asarray(b2, jnp.float32)[None, :]                 # [1, hidden]
    b3k = jnp.full((1, out_pad), -jnp.inf, jnp.float32)
    b3k = b3k.at[0, :output_dim].set(jnp.asarray(b3, jnp.float32))

    return (w1k, b1k, w2k, b2k, w3k, b3k), output_dim


def policy_network_forward(x, kernel_params, *, output_dim, tile_b=512):
    """x: [B, input_dim]. Returns softmax probs [B, output_dim] (f32)."""
    w1k, b1k, w2k, b2k, w3k, b3k = kernel_params
    B, input_dim = x.shape
    hidden_dim = w1k.shape[1]
    out_pad = w3k.shape[1]
    compute_dtype = w1k.dtype

    # Batch tile: large by default; shrink (to a multiple of 8) for tiny batches.
    tb = min(tile_b, _round_up(max(B, 1), 8))
    b_pad = _round_up(B, tb)

    xk = x.astype(compute_dtype)
    if b_pad != B:
        xk = jnp.pad(xk, ((0, b_pad - B), (0, 0)))

    grid = (b_pad // tb,)
    const = lambda i: (0, 0)

    param_bytes = sum(int(p.size) * p.dtype.itemsize for p in kernel_params)
    cost = pl.CostEstimate(
        flops=2 * b_pad * (input_dim * hidden_dim
                           + hidden_dim * hidden_dim
                           + hidden_dim * out_pad),
        transcendentals=b_pad * (2 * hidden_dim + out_pad),
        bytes_accessed=int(xk.size) * xk.dtype.itemsize
        + param_bytes + b_pad * out_pad * 4,
    )

    probs_pad = pl.pallas_call(
        policy_mlp_kernel,
        out_shape=jax.ShapeDtypeStruct((b_pad, out_pad), jnp.float32),
        grid=grid,
        in_specs=[
            pl.BlockSpec((tb, input_dim), lambda i: (i, 0)),        # x tile
            pl.BlockSpec((input_dim, hidden_dim), const),           # w1 (resident)
            pl.BlockSpec((1, hidden_dim), const),                   # b1
            pl.BlockSpec((hidden_dim, hidden_dim), const),          # w2
            pl.BlockSpec((1, hidden_dim), const),                   # b2
            pl.BlockSpec((hidden_dim, out_pad), const),             # w3 (padded)
            pl.BlockSpec((1, out_pad), const),                      # b3 (padded)
        ],
        out_specs=pl.BlockSpec((tb, out_pad), lambda i: (i, 0)),    # lane-dense
        compiler_params=pltpu.CompilerParams(
            dimension_semantics=("parallel",)),
        cost_estimate=cost,
    )(xk, w1k, b1k, w2k, b2k, w3k, b3k)

    return probs_pad[:B, :output_dim]


policy_network_forward_jit = jax.jit(
    policy_network_forward, static_argnames=("output_dim", "tile_b"))


def _reference_forward(x, torch_params):
    w1, b1, w2, b2, w3, b3 = torch_params
    h = jnp.tanh(x @ w1.T + b1)
    h = jnp.tanh(h @ w2.T + b2)
    return jax.nn.softmax(h @ w3.T + b3, axis=-1)


# TODO(synk): optimizer (Adam) and get_action's multinomial sampling are host-side
# training/acting utilities, not part of the forward pass; they are not kernelized.

if __name__ == "__main__":
    key = jax.random.PRNGKey(0)
    k_params, k_x1, k_x2 = jax.random.split(key, 3)

    input_dim, hidden_dim, output_dim = 4, 128, 2
    torch_params = init_params(k_params, input_dim, hidden_dim, output_dim)

    # ---- f32 path, small batch (single grid step) -----------------------------
    batch = 8
    x = jax.random.normal(k_x1, (batch, input_dim), jnp.float32)
    params_f32, odim = prepare_params(torch_params, jnp.float32)
    probs = policy_network_forward_jit(x, params_f32, output_dim=odim)
    jax.block_until_ready(probs)

    ref = _reference_forward(x, torch_params)
    assert probs.shape == (batch, output_dim)
    assert jnp.allclose(probs, ref, atol=1e-5, rtol=1e-5)
    assert jnp.allclose(jnp.sum(probs, axis=-1), 1.0, atol=1e-5)

    # ---- f32 path, non-multiple batch with multi-step grid (padding + grid) ---
    batch2 = 20
    x2 = jax.random.normal(k_x2, (batch2, input_dim), jnp.float32)
    probs2 = policy_network_forward_jit(x2, params_f32, output_dim=odim, tile_b=8)
    jax.block_until_ready(probs2)
    ref2 = _reference_forward(x2, torch_params)
    assert probs2.shape == (batch2, output_dim)
    assert jnp.allclose(probs2, ref2, atol=1e-5, rtol=1e-5)

    # ---- bf16 matmul-operand path (bandwidth win on v6e/v7x; f32 elementwise) -
    params_bf16, _ = prepare_params(torch_params, jnp.bfloat16)
    probs_bf16 = policy_network_forward_jit(x, params_bf16, output_dim=odim)
    jax.block_until_ready(probs_bf16)
    assert jnp.allclose(probs_bf16, ref, atol=5e-2, rtol=5e-2)
    assert jnp.allclose(jnp.sum(probs_bf16, axis=-1), 1.0, atol=1e-5)

    print("KERNEL_OK")
</pallas_src>

<mosaic_0001>
module attributes {stable_mosaic.version = 11 : i64} {
  func.func @policy_mlp_kernel(%arg0: i32, %arg1: memref<8x4xf32, #tpu.memory_space<vmem>>, %arg2: memref<4x128xf32, #tpu.memory_space<vmem>>, %arg3: memref<1x128xf32, #tpu.memory_space<vmem>>, %arg4: memref<128x128xf32, #tpu.memory_space<vmem>>, %arg5: memref<1x128xf32, #tpu.memory_space<vmem>>, %arg6: memref<128x128xf32, #tpu.memory_space<vmem>>, %arg7: memref<1x128xf32, #tpu.memory_space<vmem>>, %arg8: memref<8x128xf32, #tpu.memory_space<vmem>>) attributes {dimension_semantics = [#tpu.dimension_semantics<parallel>], iteration_bounds = array<i64: 1>, scalar_prefetch = 0 : i64, scratch_operands = 0 : i64, tpu.core_type = #tpu.core_type<tc>, window_params = [{transform_indices = @transform_0, window_bounds = array<i64: 8, 4>}, {pipeline_mode = #tpu.pipeline_mode<synchronous>, transform_indices = @transform_1, window_bounds = array<i64: 4, 128>}, {pipeline_mode = #tpu.pipeline_mode<synchronous>, transform_indices = @transform_2, window_bounds = array<i64: 1, 128>}, {pipeline_mode = #tpu.pipeline_mode<synchronous>, transform_indices = @transform_3, window_bounds = array<i64: 128, 128>}, {pipeline_mode = #tpu.pipeline_mode<synchronous>, transform_indices = @transform_4, window_bounds = array<i64: 1, 128>}, {pipeline_mode = #tpu.pipeline_mode<synchronous>, transform_indices = @transform_5, window_bounds = array<i64: 128, 128>}, {pipeline_mode = #tpu.pipeline_mode<synchronous>, transform_indices = @transform_6, window_bounds = array<i64: 1, 128>}, {transform_indices = @transform_7, window_bounds = array<i64: 8, 128>}]} {
    %c0 = arith.constant 0 : index
    %c0_0 = arith.constant 0 : index
    %0 = vector.load %arg1[%c0, %c0_0] : memref<8x4xf32, #tpu.memory_space<vmem>>, vector<8x4xf32>
    %c0_1 = arith.constant 0 : index
    %c0_2 = arith.constant 0 : index
    %1 = vector.load %arg2[%c0_1, %c0_2] : memref<4x128xf32, #tpu.memory_space<vmem>>, vector<4x128xf32>
    %cst = arith.constant dense<0.000000e+00> : vector<8x128xf32>
    %2 = tpu.matmul %0, %1, %cst {dimension_numbers = #tpu.dot_dimension_numbers<[1], [0], [0], [1], [0, 0, 1, 1], [], []>} : vector<8x4xf32>, vector<4x128xf32>, vector<8x128xf32> -> vector<8x128xf32>
    %c0_3 = arith.constant 0 : index
    %c0_4 = arith.constant 0 : index
    %3 = vector.load %arg3[%c0_3, %c0_4] : memref<1x128xf32, #tpu.memory_space<vmem>>, vector<1x128xf32>
    %4 = vector.broadcast %3 : vector<1x128xf32> to vector<8x128xf32>
    %5 = arith.addf %2, %4 : vector<8x128xf32>
    %6 = math.tanh %5 : vector<8x128xf32>
    %c0_5 = arith.constant 0 : index
    %c0_6 = arith.constant 0 : index
    %7 = vector.load %arg4[%c0_5, %c0_6] : memref<128x128xf32, #tpu.memory_space<vmem>>, vector<128x128xf32>
    %cst_7 = arith.constant dense<0.000000e+00> : vector<8x128xf32>
    %8 = tpu.matmul %6, %7, %cst_7 {dimension_numbers = #tpu.dot_dimension_numbers<[1], [0], [0], [1], [0, 0, 1, 1], [], []>} : vector<8x128xf32>, vector<128x128xf32>, vector<8x128xf32> -> vector<8x128xf32>
    %c0_8 = arith.constant 0 : index
    %c0_9 = arith.constant 0 : index
    %9 = vector.load %arg5[%c0_8, %c0_9] : memref<1x128xf32, #tpu.memory_space<vmem>>, vector<1x128xf32>
    %10 = vector.broadcast %9 : vector<1x128xf32> to vector<8x128xf32>
    %11 = arith.addf %8, %10 : vector<8x128xf32>
    %12 = math.tanh %11 : vector<8x128xf32>
    %c0_10 = arith.constant 0 : index
    %c0_11 = arith.constant 0 : index
    %13 = vector.load %arg6[%c0_10, %c0_11] : memref<128x128xf32, #tpu.memory_space<vmem>>, vector<128x128xf32>
    %cst_12 = arith.constant dense<0.000000e+00> : vector<8x128xf32>
    %14 = tpu.matmul %12, %13, %cst_12 {dimension_numbers = #tpu.dot_dimension_numbers<[1], [0], [0], [1], [0, 0, 1, 1], [], []>} : vector<8x128xf32>, vector<128x128xf32>, vector<8x128xf32> -> vector<8x128xf32>
    %c0_13 = arith.constant 0 : index
    %c0_14 = arith.constant 0 : index
    %15 = vector.load %arg7[%c0_13, %c0_14] : memref<1x128xf32, #tpu.memory_space<vmem>>, vector<1x128xf32>
    %16 = vector.broadcast %15 : vector<1x128xf32> to vector<8x128xf32>
    %17 = arith.addf %14, %16 : vector<8x128xf32>
    %cst_15 = arith.constant dense<0xFF800000> : vector<8xf32>
    %18 = vector.multi_reduction <maximumf>, %17, %cst_15 [1] : vector<8x128xf32> to vector<8xf32>
    %19 = vector.shape_cast %18 : vector<8xf32> to vector<8x1xf32>
    %20 = vector.broadcast %19 : vector<8x1xf32> to vector<8x128xf32>
    %21 = arith.subf %17, %20 : vector<8x128xf32>
    %22 = math.exp %21 : vector<8x128xf32>
    %cst_16 = arith.constant dense<0.000000e+00> : vector<8xf32>
    %23 = vector.multi_reduction <add>, %22, %cst_16 [1] : vector<8x128xf32> to vector<8xf32>
    %24 = vector.shape_cast %23 : vector<8xf32> to vector<8x1xf32>
    %25 = tpu.reciprocal %24 : vector<8x1xf32> -> vector<8x1xf32>
    %26 = vector.broadcast %25 : vector<8x1xf32> to vector<8x128xf32>
    %27 = arith.mulf %22, %26 : vector<8x128xf32>
    %c0_17 = arith.constant 0 : index
    %c0_18 = arith.constant 0 : index
    %28 = vector.load %arg8[%c0_17, %c0_18] : memref<8x128xf32, #tpu.memory_space<vmem>>, vector<8x128xf32>
    tpu.vector_store %arg8[%c0_17, %c0_18], %27 {strides = array<i32>} : memref<8x128xf32, #tpu.memory_space<vmem>>, vector<8x128xf32>,
    return
  }
  func.func @transform_0(%arg0: i32) -> (i32, i32) {
    %c0_i32 = arith.constant 0 : i32
    %c0_i32_0 = arith.constant 0 : i32
    return %arg0, %c0_i32 : i32, i32
  }
  func.func @transform_1(%arg0: i32) -> (i32, i32) {
    %c0_i32 = arith.constant 0 : i32
    %c0_i32_0 = arith.constant 0 : i32
    %c0_i32_1 = arith.constant 0 : i32
    return %c0_i32, %c0_i32_0 : i32, i32
  }
  func.func @transform_2(%arg0: i32) -> (i32, i32) {
    %c0_i32 = arith.constant 0 : i32
    %c0_i32_0 = arith.constant 0 : i32
    %c0_i32_1 = arith.constant 0 : i32
    return %c0_i32, %c0_i32_0 : i32, i32
  }
  func.func @transform_3(%arg0: i32) -> (i32, i32) {
    %c0_i32 = arith.constant 0 : i32
    %c0_i32_0 = arith.constant 0 : i32
    %c0_i32_1 = arith.constant 0 : i32
    return %c0_i32, %c0_i32_0 : i32, i32
  }
  func.func @transform_4(%arg0: i32) -> (i32, i32) {
    %c0_i32 = arith.constant 0 : i32
    %c0_i32_0 = arith.constant 0 : i32
    %c0_i32_1 = arith.constant 0 : i32
    return %c0_i32, %c0_i32_0 : i32, i32
  }
  func.func @transform_5(%arg0: i32) -> (i32, i32) {
    %c0_i32 = arith.constant 0 : i32
    %c0_i32_0 = arith.constant 0 : i32
    %c0_i32_1 = arith.constant 0 : i32
    return %c0_i32, %c0_i32_0 : i32, i32
  }
  func.func @transform_6(%arg0: i32) -> (i32, i32) {
    %c0_i32 = arith.constant 0 : i32
    %c0_i32_0 = arith.constant 0 : i32
    %c0_i32_1 = arith.constant 0 : i32
    return %c0_i32, %c0_i32_0 : i32, i32
  }
  func.func @transform_7(%arg0: i32) -> (i32, i32) {
    %c0_i32 = arith.constant 0 : i32
    %c0_i32_0 = arith.constant 0 : i32
    return %arg0, %c0_i32 : i32, i32
  }
}

</mosaic_0001>

<bundles_post_ra>
// kernel: policy_network_forward.1
= control target key start
LH: loop header
LB: loop body
LE: loop exit
PB: predicated region body
PF: predicated region fallthrough
CT: control target
= control target key end

     0   :  { %12 = vsyncpa [#allocation3], 0  ;;  %s680_s0 = inlined_call_operand.vmem [shape: f32[8,4], index: 0, kind: input, shape index: {}]   ;;  %s681_s1 = inlined_call_operand.vmem [shape: f32[4,128], index: 1, kind: input, shape index: {}]   ;;  %s682_s2 = inlined_call_operand.vmem [shape: f32[1,128], index: 2, kind: input, shape index: {}]   ;;  %s683_s3 = inlined_call_operand.hbm [shape: f32[128,128], index: 3, kind: input, shape index: {}]   ;;  %s684_s4 = inlined_call_operand.vmem [shape: f32[1,128], index: 4, kind: input, shape index: {}]   ;;  %s685_s5 = inlined_call_operand.hbm [shape: f32[128,128], index: 5, kind: input, shape index: {}]   ;;  %s686_s6 = inlined_call_operand.vmem [shape: f32[1,128], index: 6, kind: input, shape index: {}]   ;;  %s687_s7 = inlined_call_operand.vmem [shape: f32[8,128], index: 7, kind: output, shape index: {}]  }
   0x1   :  { %13 = vsyncpa [#allocation5], 0  ;;  %s572_s24 = smov [#allocation2]   ;;  %s524_s28 = scalar_lea.hbm %s683_s3, 2048 }
   0x2   :  { %s25_s25 = sshll.u32 %s572_s24, 4  ;;  %p525_p0 = scmp.ne.s32.totalorder %s683_s3, %s524_s28  ;;  %s26_s25 = int_to_ptr.vmem [resolvable:$true] %s25_s25 }
   0x3   :  { %p528_p1 = scmp.lt.u32.totalorder %s524_s28, %s683_s3 }
   0x5   :  { %p530_p2 = pnand %p528_p1, %p525_p0 }
   0x7   :  { %533 = shalt.err (!%p530_p2)
}
   0x8   :  { %s534_s10 = scalar_lea.vmem %s26_s25, 2048  ;;  %p539_p4 = scmp.lt.s32.totalorder %s26_s25, %s26_s25 }
   0x9   :  { %p535_p3 = scmp.ne.s32.totalorder %s26_s25, %s534_s10  ;;  %p540_p5 = scmp.lt.s32.totalorder %s534_s10, %s534_s10 }
   0xb   :  { %p541_p6 = por %p540_p5, %p539_p4 }
   0xd   :  { %p542_p7 = pnand %p541_p6, %p535_p3 }
   0xf   :  { %545 = shalt.err (!%p542_p7)
}
  0x10   :  { %s573_s11 = smov 128   ;;  %s574_s12 = smov 8  }
  0x11   :  { %31 = dma.hbm_to_vmem [thread:$0]  %s683_s3, 2048, %s26_s25, [#allocation3], %s573_s11, %s573_s11, %s574_s12  }
  0x12   :  { %s575_s15 = smov [#allocation4]   ;;  %s546_s19 = scalar_lea.hbm %s685_s5, 2048 }
  0x13   :  { %s39_s16 = sshll.u32 %s575_s15, 4  ;;  %p547_p8 = scmp.ne.s32.totalorder %s685_s5, %s546_s19  ;;  %s40_s16 = int_to_ptr.vmem [resolvable:$true] %s39_s16 }
  0x14   :  { %p550_p9 = scmp.lt.u32.totalorder %s546_s19, %s685_s5 }
  0x16   :  { %p552_p10 = pnand %p550_p9, %p547_p8 }
  0x18   :  { %555 = shalt.err (!%p552_p10)
}
  0x19   :  { %s556_s24 = scalar_lea.vmem %s40_s16, 2048  ;;  %p561_p12 = scmp.lt.s32.totalorder %s40_s16, %s40_s16 }
  0x1a   :  { %p557_p11 = scmp.ne.s32.totalorder %s40_s16, %s556_s24  ;;  %p562_p13 = scmp.lt.s32.totalorder %s556_s24, %s556_s24 }
  0x1c   :  { %p563_p0 = por %p562_p13, %p561_p12 }
  0x1e   :  { %p564_p1 = pnand %p563_p0, %p557_p11 }
  0x20   :  { %567 = shalt.err (!%p564_p1)
}
  0x21   :  { %45 = dma.hbm_to_vmem [thread:$0]  %s685_s5, 2048, %s40_s16, [#allocation5], %s573_s11, %s573_s11, %s574_s12  }
  0x22   :  { %568 = dma.done.wait [#allocation3], 2048  }
  0x23   :  { %569 = vsyncadd [#allocation3], 4294965248 }
  0x24   :  { %570 = dma.done.wait [#allocation5], 2048  }
  0x25   :  { %571 = vsyncadd [#allocation5], 4294965248  ;;  %v576_v0 = vmov 0.0   ;;  %vm577_vm0 = vmmov 0   ;;  %v578_v1 = vmov 0.0|0.0   ;;  %vm67_vm1 = vcmask 1043456  }
  0x26   :  { %386 = vmatprep.subr.mxu0 %v576_v0  ;;  %388 = vmatprep.mubr.msk.f32.mxu0 %vm577_vm0, %v576_v0  ;;  %vm63_vm2 = vcmask 31744   ;;  %v55_v2 = vld [vmem:[%s681_s1] sm:$0xf]  ;;  %v143_v5 = vld [vmem:[#allocation2 + $0x8] sm:$0xff]  ;;  %v144_v6 = vld [vmem:[#allocation2 + $0x10] sm:$0xff] }
  0x27   :  { %461 = vmatprep.subr.bf16.mxu1 %v578_v1  ;;  %423 = vmatprep.mubr.msk.f32.mxu1 %vm577_vm0, %v576_v0  ;;  %v54_v3 = vld [vmem:[%s680_s0] sm:$0xff]  ;;  %v145_v7 = vld [vmem:[#allocation2 + $0x18] sm:$0xff]  ;;  %v147_v11 = vld [vmem:[#allocation2 + $0x28] sm:$0xff] }
  0x28   :  { %v142_v4 = vld [vmem:[#allocation2] sm:$0xff]  ;;  %387 = vmatpush3.msk.msra.mxu0 %vm67_vm1, %v55_v2  ;;  %v465_v9 = vpack.c.bf16 %v145_v7, %v144_v6  ;;  %v148_v13 = vld [vmem:[#allocation2 + $0x30] sm:$0xff]  ;;  %v149_v14 = vld [vmem:[#allocation2 + $0x38] sm:$0xff] }
  0x29   :  { %389 = vmatmul.mubr.msk.f32.vlgmr.msra.gmra.mrb[0].mxu0 %vm63_vm2, %v54_v3  ;;  %v462_v8 = vpack.c.bf16 %v143_v5, %v142_v4  ;;  %485 = vmatprep.subr.bf16.mxu0 %v578_v1  ;;  %v146_v10 = vld [vmem:[#allocation2 + $0x20] sm:$0xff]  ;;  %v471_v15 = vpack.c.bf16 %v149_v14, %v148_v13  ;;  %v151_v17 = vld [vmem:[#allocation2 + $0x48] sm:$0xff]  ;;  %v152_v19 = vld [vmem:[#allocation2 + $0x50] sm:$0xff] }
  0x2a   :  { %458 = vmatprep.mubr.msk.f32.mxu0 %vm577_vm0, %v576_v0  ;;  %v468_v12 = vpack.c.bf16 %v147_v11, %v146_v10  ;;  %v150_v16 = vld [vmem:[#allocation2 + $0x40] sm:$0xff]  ;;  %v153_v20 = vld [vmem:[#allocation2 + $0x58] sm:$0xff]  ;;  %v155_v23 = vld [vmem:[#allocation2 + $0x68] sm:$0xff] }
  0x2b   :  { %463 = vmatpush3.bf16.msra.mxu1 %v462_v8  ;;  %v474_v18 = vpack.c.bf16 %v151_v17, %v150_v16  ;;  %v477_v21 = vpack.c.bf16 %v153_v20, %v152_v19  ;;  %v154_v22 = vld [vmem:[#allocation2 + $0x60] sm:$0xff]  ;;  %v156_v25 = vld [vmem:[#allocation2 + $0x70] sm:$0xff]  ;;  %v157_v26 = vld [vmem:[#allocation2 + $0x78] sm:$0xff] }
  0x2c   :  { %464 = vmatprep.subr.bf16.mxu1 %v578_v1  ;;  %v480_v24 = vpack.c.bf16 %v155_v23, %v154_v22  ;;  %v483_v27 = vpack.c.bf16 %v157_v26, %v156_v25  ;;  %v236_v28 = vld [vmem:[#allocation4] sm:$0xff]  ;;  %v237_v29 = vld [vmem:[#allocation4 + $0x8] sm:$0xff]  ;;  %v238_v30 = vld [vmem:[#allocation4 + $0x10] sm:$0xff] }
  0x2d   :  { %v486_v31 = vpack.c.bf16 %v237_v29, %v236_v28  ;;  %v239_v32 = vld [vmem:[#allocation4 + $0x18] sm:$0xff]  ;;  %v240_v34 = vld [vmem:[#allocation4 + $0x20] sm:$0xff]  ;;  %v241_v35 = vld [vmem:[#allocation4 + $0x28] sm:$0xff] }
  0x2e   :  { %v489_v33 = vpack.c.bf16 %v239_v32, %v238_v30  ;;  %v492_v36 = vpack.c.bf16 %v241_v35, %v240_v34  ;;  %v242_v37 = vld [vmem:[#allocation4 + $0x30] sm:$0xff]  ;;  %v243_v38 = vld [vmem:[#allocation4 + $0x38] sm:$0xff]  ;;  %v244_v40 = vld [vmem:[#allocation4 + $0x40] sm:$0xff] }
  0x2f   :  { %466 = vmatpush3.bf16.msra.mxu1 %v465_v9  ;;  %487 = vmatpush3.bf16.msra.mxu0 %v486_v31  ;;  %v495_v39 = vpack.c.bf16 %v243_v38, %v242_v37  ;;  %v245_v41 = vld [vmem:[#allocation4 + $0x48] sm:$0xff]  ;;  %v345_v43 = vld [vmem:[%s682_s2] ss:$0 sm:$0xff]  ;;  %v246_v48 = vld [vmem:[#allocation4 + $0x50] sm:$0xff] }
  0x30   :  { %467 = vmatprep.subr.bf16.mxu1 %v578_v1  ;;  %488 = vmatprep.subr.bf16.mxu0 %v578_v1  ;;  %v498_v42 = vpack.c.bf16 %v245_v41, %v244_v40  ;;  %v247_v49 = vld [vmem:[#allocation4 + $0x58] sm:$0xff]  ;;  %v248_v51 = vld [vmem:[#allocation4 + $0x60] sm:$0xff]  ;;  %v249_v52 = vld [vmem:[#allocation4 + $0x68] sm:$0xff] }
  0x31   :  { %v501_v50 = vpack.c.bf16 %v247_v49, %v246_v48  ;;  %v504_v53 = vpack.c.bf16 %v249_v52, %v248_v51  ;;  %v250_v54 = vld [vmem:[#allocation4 + $0x70] sm:$0xff]  ;;  %v251_v55 = vld [vmem:[#allocation4 + $0x78] sm:$0xff]  ;;  %v348_v57 = vld [vmem:[%s684_s4] ss:$0 sm:$0xff] }
  0x32   :  { %v507_v56 = vpack.c.bf16 %v251_v55, %v250_v54  ;;  %v349_v62 = vld [vmem:[%s686_s6] ss:$0 sm:$0xff] }
  0x33   :  { %469 = vmatpush3.bf16.msra.mxu1 %v468_v12  ;;  %490 = vmatpush3.bf16.msra.mxu0 %v489_v33 }
  0x34   :  { %470 = vmatprep.subr.bf16.mxu1 %v578_v1  ;;  %491 = vmatprep.subr.bf16.mxu0 %v578_v1 }
  0x37   :  { %472 = vmatpush3.bf16.msra.mxu1 %v471_v15  ;;  %493 = vmatpush3.bf16.msra.mxu0 %v492_v36 }
  0x38   :  { %473 = vmatprep.subr.bf16.mxu1 %v578_v1  ;;  %494 = vmatprep.subr.bf16.mxu0 %v578_v1 }
  0x3b   :  { %475 = vmatpush3.bf16.msra.mxu1 %v474_v18  ;;  %496 = vmatpush3.bf16.msra.mxu0 %v495_v39 }
  0x3c   :  { %476 = vmatprep.subr.bf16.mxu1 %v578_v1  ;;  %497 = vmatprep.subr.bf16.mxu0 %v578_v1 }
  0x3f   :  { %478 = vmatpush3.bf16.msra.mxu1 %v477_v21  ;;  %499 = vmatpush3.bf16.msra.mxu0 %v498_v42 }
  0x40   :  { %479 = vmatprep.subr.bf16.mxu1 %v578_v1  ;;  %500 = vmatprep.subr.bf16.mxu0 %v578_v1 }
  0x43   :  { %481 = vmatpush3.bf16.msra.mxu1 %v480_v24  ;;  %502 = vmatpush3.bf16.msra.mxu0 %v501_v50 }
  0x44   :  { %482 = vmatprep.subr.bf16.mxu1 %v578_v1  ;;  %503 = vmatprep.subr.bf16.mxu0 %v578_v1 }
  0x47   :  { %484 = vmatpush3.bf16.msra.mxu1 %v483_v27  ;;  %505 = vmatpush3.bf16.msra.mxu0 %v504_v53 }
  0x48   :  { %506 = vmatprep.subr.bf16.mxu0 %v578_v1 }
  0x4b   :  { %508 = vmatpush3.bf16.msra.mxu0 %v507_v56 }
  0xfc   :  { %v137_v44 = vpop.f32.mrb[0].mxu0 }
  0xfd   :  { %v138_v45 = vadd.f32 %v345_v43, %v137_v44  ;;  %v390_v46 = vpop.f32.mrb[1].mxu0 }
  0xff   :  { %516 = vtanh.f32 %v138_v45 }
 0x109   :  { %v517_v47 = vpop.eup %516 }
 0x10a   :  { %424 = vmatmul.mubr.f32.vlgmr.msra.gmra.mrb[0].mxu1 %v517_v47 }
 0x1dd   :  { %v231_v58 = vpop.f32.mrb[0].mxu1 }
 0x1de   :  { %v232_v59 = vadd.f32 %v348_v57, %v231_v58  ;;  %v425_v60 = vpop.f32.mrb[1].mxu1 }
 0x1e0   :  { %518 = vtanh.f32 %v232_v59 }
 0x1ea   :  { %v519_v61 = vpop.eup %518 }
 0x1eb   :  { %459 = vmatmul.mubr.f32.vlgmr.msra.gmra.mrb[2].mxu0 %v519_v61 }
 0x2be   :  { %v325_v63 = vpop.f32.mrb[2].mxu0 }
 0x2bf   :  { %v326_v0 = vadd.f32 %v349_v62, %v325_v63  ;;  %v460_v2 = vpop.f32.mrb[3].mxu0 }
 0x2c1   :  { %329 = vmax.xlane.f32.xlu0 %v326_v0 }
 0x34e   :  { %v330_v1 = vpop.xlane.xlu0 %329 }
 0x34f   :  { %v331_v3 = vsub.f32 %v326_v0, %v330_v1 }
 0x351   :  { %v332_v4 = vmul.f32 1.442695, %v331_v3 }
 0x353   :  { %520 = vpow2.f32 %v332_v4 }
 0x35d   :  { %v521_v5 = vpop.eup %520 }
 0x35e   :  { %334 = vadd.xlane.f32.xlu0 %v521_v5 }
 0x3eb   :  { %v335_v6 = vpop.xlane.xlu0 %334 }
 0x3ec   :  { %522 = vrcp.f32 %v335_v6 }
 0x3f6   :  { %v523_v7 = vpop.eup %522 }
 0x3f7   :  { %v337_v8 = vmul.f32 %v523_v7, %v521_v5 }
 0x3f9   :  { %338 = vst [vmem:[%s687_s7] sm:$0xff] %v337_v8 }
 0x3fa   :  { %343 = vsyncpa [#allocation3], 1 }
 0x3fb   :  { %344 = vsyncpa [#allocation5], 1 }

</bundles_post_ra>
